<compile_context>
chip_gen: v6e
topology: v6e:2x2x1
jax: 0.10.0
libtpu: 0.0.40
codegen_flags: <defaults>
</compile_context>

<pallas_src>
import jax
import jax.numpy as jnp
from jax.experimental import pallas as pl
from jax.experimental.pallas import tpu as pltpu

EPS = 1e-6  # F.pairwise_distance default eps (added to the difference)

_MiB = 1024 * 1024
_VMEM_BUDGET_BYTES = 36 * _MiB  # total double-buffered input footprint cap


def _sublane_multiple(dtype) -> int:
    itemsize = jnp.dtype(dtype).itemsize
    return {4: 8, 2: 16, 1: 32}.get(itemsize, 8)


def _round_up(x: int, m: int) -> int:
    return ((x + m - 1) // m) * m


def _pick_block_b(B: int, D: int, dtype) -> int:
    """Batch tile from a VMEM byte budget: 3 inputs x 2 pipeline buffers x row bytes."""
    itemsize = jnp.dtype(dtype).itemsize
    sub = _sublane_multiple(dtype)
    bytes_per_row = 3 * 2 * D * itemsize
    tb = _VMEM_BUDGET_BYTES // max(bytes_per_row, 1)
    tb = (tb // sub) * sub
    tb = max(tb, sub)
    tb = min(tb, _round_up(B, sub))  # no point exceeding the (padded) batch
    return int(tb)


def contrastive_loss(anchor, positive, negative, margin=2.0, block_b=None, core_splits=2):
    B, D = anchor.shape
    assert positive.shape == (B, D) and negative.shape == (B, D)

    dtype = anchor.dtype
    itemsize = jnp.dtype(dtype).itemsize
    sub = _sublane_multiple(dtype)

    if block_b is None:
        block_b = _pick_block_b(B, D, dtype)
    block_b = max(sub, _round_up(int(block_b), sub))

    core_splits = max(1, int(core_splits))
    num_blocks = pl.cdiv(B, block_b)                 # cdiv grid: no divisibility needed
    tiles_per_core = pl.cdiv(num_blocks, core_splits)

    margin_f = float(margin)

    def kernel(a_ref, p_ref, n_ref, o_ref, acc_ref):
        c = pl.program_id(0)
        i = pl.program_id(1)

        @pl.when(i == 0)
        def _():
            acc_ref[0, 0] = jnp.float32(0.0)

        # Tail / out-of-range masking: the *logical* (un-clamped) block index tells
        # us which global rows this step is responsible for.
        row_start = (c * tiles_per_core + i) * block_b
        row_ids = jax.lax.broadcasted_iota(jnp.int32, (block_b, 1), 0)
        valid = (row_start + row_ids) < B                       # (TB, 1) bool

        a = a_ref[...].astype(jnp.float32) + EPS                # eps hoisted, added once
        p = p_ref[...].astype(jnp.float32)
        n = n_ref[...].astype(jnp.float32)

        diff1 = a - p
        diff0 = a - n

        # d1^2 is just a sum of squares: single full-tile masked reduce, no sqrt.
        sq1 = jnp.sum(jnp.where(valid, diff1 * diff1, 0.0))

        d0 = jnp.sqrt(jnp.sum(diff0 * diff0, axis=-1, keepdims=True))   # (TB, 1)
        hinge = jnp.maximum(margin_f - d0, 0.0)
        hsq = jnp.sum(jnp.where(valid, hinge * hinge, 0.0))

        acc_ref[0, 0] += sq1 + hsq

        @pl.when(i == pl.num_programs(1) - 1)
        def _():
            # Per-core partial sum, broadcast into its own lane-dense (8,128) block.
            o_ref[...] = jnp.broadcast_to(acc_ref[0, 0], o_ref.shape).astype(o_ref.dtype)

    def in_map(c, i):
        # Clamp so the DMA never addresses past the last real block; fully
        # out-of-range steps are zeroed by the in-kernel mask.
        blk = c * tiles_per_core + i
        return (jnp.minimum(blk, num_blocks - 1), 0)

    in_spec = pl.BlockSpec((block_b, D), in_map)

    footprint = 3 * 2 * block_b * D * itemsize + 2 * core_splits * 8 * 128 * 4
    vmem_limit = int(min(60 * _MiB, max(footprint + 2 * _MiB, 32 * _MiB)))

    cost = pl.CostEstimate(
        flops=8 * B * D,
        transcendentals=B,
        bytes_accessed=3 * B * D * itemsize + core_splits * 8 * 128 * 4,
    )

    out = pl.pallas_call(
        kernel,
        out_shape=jax.ShapeDtypeStruct((core_splits * 8, 128), jnp.float32),
        grid_spec=pltpu.PrefetchScalarGridSpec(
            num_scalar_prefetch=0,
            grid=(core_splits, tiles_per_core),
            in_specs=[in_spec, in_spec, in_spec],
            out_specs=pl.BlockSpec((8, 128), lambda c, i: (c, 0)),
            scratch_shapes=[pltpu.SMEM((1, 1), jnp.float32)],
        ),
        compiler_params=pltpu.CompilerParams(
            dimension_semantics=("parallel", "arbitrary"),
            vmem_limit_bytes=vmem_limit,
        ),
        cost_estimate=cost,
    )(anchor, positive, negative)

    partials = out[0::8, 0]          # one partial sum per core split
    return jnp.sum(partials) / B


def contrastive_loss_ref(anchor, positive, negative, margin=2.0):
    # Pure-JAX reference mirroring the PyTorch module (f32 accumulation).
    a = anchor.astype(jnp.float32)
    p = positive.astype(jnp.float32)
    n = negative.astype(jnp.float32)
    d1 = jnp.sqrt(jnp.sum((a - p + EPS) ** 2, axis=-1))
    d0 = jnp.sqrt(jnp.sum((a - n + EPS) ** 2, axis=-1))
    return jnp.mean(d1 ** 2 + jnp.maximum(margin - d0, 0.0) ** 2)


if __name__ == "__main__":
    key = jax.random.PRNGKey(0)
    k1, k2, k3 = jax.random.split(key, 3)

    # Case 1: small aligned f32 batch, auto tile (single block per core split).
    B, D = 64, 128
    a = jax.random.normal(k1, (B, D), dtype=jnp.float32)
    p = jax.random.normal(k2, (B, D), dtype=jnp.float32)
    n = jax.random.normal(k3, (B, D), dtype=jnp.float32)
    loss = jax.block_until_ready(contrastive_loss(a, p, n, margin=2.0))
    ref = contrastive_loss_ref(a, p, n, margin=2.0)
    assert jnp.allclose(loss, ref, rtol=1e-5, atol=1e-5), (loss, ref)

    # Case 2: ragged batch + forced small tile -> exercises cdiv grid, tail masking,
    # the multi-step accumulator and per-core partials.
    B2, D2 = 50, 96
    a2 = jax.random.normal(k1, (B2, D2), dtype=jnp.float32)
    p2 = jax.random.normal(k2, (B2, D2), dtype=jnp.float32)
    n2 = jax.random.normal(k3, (B2, D2), dtype=jnp.float32)
    loss2 = jax.block_until_ready(contrastive_loss(a2, p2, n2, margin=2.0, block_b=16))
    ref2 = contrastive_loss_ref(a2, p2, n2, margin=2.0)
    assert jnp.allclose(loss2, ref2, rtol=1e-5, atol=1e-5), (loss2, ref2)

    # Case 3: bf16 inputs (halves HBM traffic), f32 accumulation in-kernel;
    # also exercises the fully-masked clamped block on the second core split.
    B3, D3 = 48, 64
    a3 = jax.random.normal(k1, (B3, D3), dtype=jnp.float32).astype(jnp.bfloat16)
    p3 = jax.random.normal(k2, (B3, D3), dtype=jnp.float32).astype(jnp.bfloat16)
    n3 = jax.random.normal(k3, (B3, D3), dtype=jnp.float32).astype(jnp.bfloat16)
    loss3 = jax.block_until_ready(contrastive_loss(a3, p3, n3, margin=2.0, block_b=16))
    ref3 = contrastive_loss_ref(a3, p3, n3, margin=2.0)
    assert jnp.allclose(loss3, ref3, rtol=1e-4, atol=1e-4), (loss3, ref3)

    print("KERNEL_OK")
</pallas_src>

<mosaic_0001>
module attributes {stable_mosaic.version = 11 : i64} {
  func.func @kernel(%arg0: i32, %arg1: i32, %arg2: memref<64x128xf32, #tpu.memory_space<vmem>>, %arg3: memref<64x128xf32, #tpu.memory_space<vmem>>, %arg4: memref<64x128xf32, #tpu.memory_space<vmem>>, %arg5: memref<8x128xf32, #tpu.memory_space<vmem>>, %arg6: memref<1x1xf32, #tpu.memory_space<smem>>) attributes {dimension_semantics = [#tpu.dimension_semantics<parallel>, #tpu.dimension_semantics<arbitrary>], iteration_bounds = array<i64: 2, 1>, scalar_prefetch = 0 : i64, scratch_operands = 1 : i64, tpu.core_type = #tpu.core_type<tc>, window_params = [{transform_indices = @transform_0, window_bounds = array<i64: 64, 128>}, {transform_indices = @transform_1, window_bounds = array<i64: 64, 128>}, {transform_indices = @transform_2, window_bounds = array<i64: 64, 128>}, {transform_indices = @transform_3, window_bounds = array<i64: 8, 128>}]} {
    %c0_i32 = arith.constant 0 : i32
    %0 = arith.cmpi eq, %arg1, %c0_i32 : i32
    %1 = arith.extui %0 : i1 to i32
    %c0_i32_0 = arith.constant 0 : i32
    %2 = arith.cmpi ne, %1, %c0_i32_0 : i32
    scf.if %2 {
      %cst_20 = arith.constant 0.000000e+00 : f32
      %c0_21 = arith.constant 0 : index
      %c0_22 = arith.constant 0 : index
      %49 = memref.load %arg6[%c0_21, %c0_22] : memref<1x1xf32, #tpu.memory_space<smem>>
      memref.store %cst_20, %arg6[%c0_21, %c0_22] : memref<1x1xf32, #tpu.memory_space<smem>>
    } else {
    }
    %c1_i32 = arith.constant 1 : i32
    %3 = arith.muli %arg0, %c1_i32 : i32
    %4 = arith.addi %3, %arg1 : i32
    %c64_i32 = arith.constant 64 : i32
    %5 = arith.muli %4, %c64_i32 : i32
    %6 = tpu.iota {dimensions = array<i32: 0>} : vector<64x1xi32>
    %7 = vector.broadcast %5 : i32 to vector<64x1xi32>
    %8 = arith.addi %7, %6 : vector<64x1xi32>
    %c64_i32_1 = arith.constant 64 : i32
    %9 = vector.broadcast %c64_i32_1 : i32 to vector<64x1xi32>
    %10 = arith.cmpi slt, %8, %9 : vector<64x1xi32>
    %c0 = arith.constant 0 : index
    %c0_2 = arith.constant 0 : index
    %11 = vector.load %arg2[%c0, %c0_2] : memref<64x128xf32, #tpu.memory_space<vmem>>, vector<64x128xf32>
    %cst = arith.constant 9.99999997E-7 : f32
    %12 = vector.broadcast %cst : f32 to vector<64x128xf32>
    %13 = arith.addf %11, %12 : vector<64x128xf32>
    %c0_3 = arith.constant 0 : index
    %c0_4 = arith.constant 0 : index
    %14 = vector.load %arg3[%c0_3, %c0_4] : memref<64x128xf32, #tpu.memory_space<vmem>>, vector<64x128xf32>
    %c0_5 = arith.constant 0 : index
    %c0_6 = arith.constant 0 : index
    %15 = vector.load %arg4[%c0_5, %c0_6] : memref<64x128xf32, #tpu.memory_space<vmem>>, vector<64x128xf32>
    %16 = arith.subf %13, %14 : vector<64x128xf32>
    %17 = arith.subf %13, %15 : vector<64x128xf32>
    %18 = arith.mulf %16, %16 : vector<64x128xf32>
    %cst_7 = arith.constant 0.000000e+00 : f32
    %19 = vector.shape_cast %10 : vector<64x1xi1> to vector<64x1xi1>
    %20 = vector.broadcast %19 : vector<64x1xi1> to vector<64x128xi1>
    %21 = vector.broadcast %cst_7 : f32 to vector<64x128xf32>
    %22 = arith.select %20, %18, %21 : vector<64x128xi1>, vector<64x128xf32>
    %23 = vector.shape_cast %22 : vector<64x128xf32> to vector<1x64x128xf32>
    %cst_8 = arith.constant dense<0.000000e+00> : vector<1xf32>
    %24 = vector.multi_reduction <add>, %23, %cst_8 [1, 2] : vector<1x64x128xf32> to vector<1xf32>
    %25 = vector.shape_cast %24 : vector<1xf32> to vector<1x1x1xf32>
    %26 = vector.extract %25[0, 0, 0] : f32 from vector<1x1x1xf32>
    %27 = arith.mulf %17, %17 : vector<64x128xf32>
    %cst_9 = arith.constant dense<0.000000e+00> : vector<64xf32>
    %28 = vector.multi_reduction <add>, %27, %cst_9 [1] : vector<64x128xf32> to vector<64xf32>
    %29 = vector.shape_cast %28 : vector<64xf32> to vector<64x1xf32>
    %30 = math.sqrt %29 : vector<64x1xf32>
    %cst_10 = arith.constant 2.000000e+00 : f32
    %31 = vector.broadcast %cst_10 : f32 to vector<64x1xf32>
    %32 = arith.subf %31, %30 : vector<64x1xf32>
    %cst_11 = arith.constant 0.000000e+00 : f32
    %33 = vector.broadcast %cst_11 : f32 to vector<64x1xf32>
    %34 = arith.maximumf %32, %33 : vector<64x1xf32>
    %35 = arith.mulf %34, %34 : vector<64x1xf32>
    %cst_12 = arith.constant 0.000000e+00 : f32
    %36 = vector.broadcast %cst_12 : f32 to vector<64x1xf32>
    %37 = arith.select %10, %35, %36 : vector<64x1xi1>, vector<64x1xf32>
    %38 = vector.shape_cast %37 : vector<64x1xf32> to vector<1x64x1xf32>
    %cst_13 = arith.constant dense<0.000000e+00> : vector<1xf32>
    %39 = vector.multi_reduction <add>, %38, %cst_13 [1, 2] : vector<1x64x1xf32> to vector<1xf32>
    %40 = vector.shape_cast %39 : vector<1xf32> to vector<1x1x1xf32>
    %41 = vector.extract %40[0, 0, 0] : f32 from vector<1x1x1xf32>
    %c0_14 = arith.constant 0 : index
    %c0_15 = arith.constant 0 : index
    %42 = memref.load %arg6[%c0_14, %c0_15] : memref<1x1xf32, #tpu.memory_space<smem>>
    %43 = arith.addf %26, %41 : f32
    %44 = arith.addf %42, %43 : f32
    %c0_16 = arith.constant 0 : index
    %c0_17 = arith.constant 0 : index
    %45 = memref.load %arg6[%c0_16, %c0_17] : memref<1x1xf32, #tpu.memory_space<smem>>
    memref.store %44, %arg6[%c0_16, %c0_17] : memref<1x1xf32, #tpu.memory_space<smem>>
    %c0_i32_18 = arith.constant 0 : i32
    %46 = arith.cmpi eq, %arg1, %c0_i32_18 : i32
    %47 = arith.extui %46 : i1 to i32
    %c0_i32_19 = arith.constant 0 : i32
    %48 = arith.cmpi ne, %47, %c0_i32_19 : i32
    scf.if %48 {
      %c0_20 = arith.constant 0 : index
      %c0_21 = arith.constant 0 : index
      %49 = memref.load %arg6[%c0_20, %c0_21] : memref<1x1xf32, #tpu.memory_space<smem>>
      %50 = vector.broadcast %49 : f32 to vector<8x128xf32>
      %c0_22 = arith.constant 0 : index
      %c0_23 = arith.constant 0 : index
      %51 = vector.load %arg5[%c0_22, %c0_23] : memref<8x128xf32, #tpu.memory_space<vmem>>, vector<8x128xf32>
      tpu.vector_store %arg5[%c0_22, %c0_23], %50 {strides = array<i32>} : memref<8x128xf32, #tpu.memory_space<vmem>>, vector<8x128xf32>,
    } else {
    }
    return
  }
  func.func @transform_0(%arg0: i32, %arg1: i32) -> (i32, i32) {
    %c1_i32 = arith.constant 1 : i32
    %0 = arith.muli %arg0, %c1_i32 : i32
    %1 = arith.addi %0, %arg1 : i32
    %c0_i32 = arith.constant 0 : i32
    %2 = arith.minsi %1, %c0_i32 : i32
    %c0_i32_0 = arith.constant 0 : i32
    %c0_i32_1 = arith.constant 0 : i32
    return %2, %c0_i32_0 : i32, i32
  }
  func.func @transform_1(%arg0: i32, %arg1: i32) -> (i32, i32) {
    %c1_i32 = arith.constant 1 : i32
    %0 = arith.muli %arg0, %c1_i32 : i32
    %1 = arith.addi %0, %arg1 : i32
    %c0_i32 = arith.constant 0 : i32
    %2 = arith.minsi %1, %c0_i32 : i32
    %c0_i32_0 = arith.constant 0 : i32
    %c0_i32_1 = arith.constant 0 : i32
    return %2, %c0_i32_0 : i32, i32
  }
  func.func @transform_2(%arg0: i32, %arg1: i32) -> (i32, i32) {
    %c1_i32 = arith.constant 1 : i32
    %0 = arith.muli %arg0, %c1_i32 : i32
    %1 = arith.addi %0, %arg1 : i32
    %c0_i32 = arith.constant 0 : i32
    %2 = arith.minsi %1, %c0_i32 : i32
    %c0_i32_0 = arith.constant 0 : i32
    %c0_i32_1 = arith.constant 0 : i32
    return %2, %c0_i32_0 : i32, i32
  }
  func.func @transform_3(%arg0: i32, %arg1: i32) -> (i32, i32) {
    %c0_i32 = arith.constant 0 : i32
    %c0_i32_0 = arith.constant 0 : i32
    return %arg0, %c0_i32 : i32, i32
  }
}

</mosaic_0001>

<bundles_post_ra>
// kernel: tpu_custom_call.1
= control target key start
LH: loop header
LB: loop body
LE: loop exit
PB: predicated region body
PF: predicated region fallthrough
CT: control target
= control target key end

     0   :  { %8 = vsyncpa [#allocation4], 0  ;;  %s1458_s0 = inlined_call_operand.hbm [shape: f32[64,128], index: 0, kind: input, shape index: {}]   ;;  %s1459_s1 = inlined_call_operand.hbm [shape: f32[64,128], index: 1, kind: input, shape index: {}]   ;;  %s1460_s2 = inlined_call_operand.hbm [shape: f32[64,128], index: 2, kind: input, shape index: {}]   ;;  %s1461_s3 = inlined_call_operand.hbm [shape: f32[16,128], index: 3, kind: output, shape index: {}]  }
   0x1   :  { %10 = vsyncpa [#allocation4 + $0x1], 0 }
   0x2   :  { %11 = vsyncpa [#allocation7], 0 }
   0x3   :  { %13 = vsyncpa [#allocation7 + $0x1], 0 }
   0x4   :  { %14 = vsyncpa [#allocation5], 0 }
   0x5   :  { %16 = vsyncpa [#allocation5 + $0x1], 0  ;;  %s1091_s12 = smov 0   ;;  %s1093_s13 = smov 0  }
   0x6   :  { %s1095_s14 = smov 0   ;;  %s1097_s15 = smov 0  }
   0x7   :  { %s1099_s16 = smov 0   ;;  %s1101_s17 = smov 0  }
   0x8   :  { %s1103_s18 = smov 0   ;;  %s1105_s19 = smov 0  }
   0x9 LB: > { %1470 = sst [smem:[#allocation13_spill]] %s1059_s18  ;;  %s1130_s20 = sadd.s32 4294967295, %s1063_s19   ;;  %s1063_s19 = sphi %s1105_s19, %s22_s19   ;;  %s1059_s18 = sphi %s1103_s18, %s1490_s18   ;;  %s1055_s17 = sphi %s1101_s17, %s1489_s17   ;;  %s1051_s16 = sphi %s1099_s16, %s1448_s16   ;;  %s1047_s15 = sphi %s1097_s15, %s1494_s15   ;;  %s1043_s14 = sphi %s1095_s14, %s1493_s14   ;;  %s1039_s13 = sphi %s1093_s13, %s1492_s13   ;;  %s1035_s12 = sphi %s1091_s12, %s1491_s12  }
   0xa   : > { %s731_s21 = sadd.s32 4294967294, %s1063_s19   ;;  %s34_s22 = sadd.s32 1, %s1059_s18 }
   0xb   : > { %p36_p0 = scmp.ge.s32.totalorder %s34_s22, 2  ;;  %p1032_p1 = scmp.ne.s32.totalorder %s1051_s16, 0 }
   0xc   : > { %p55_p2 = scmp.eq.s32.totalorder %s1063_s19, 0  ;;  %p60_p3 = scmp.ne.s32.totalorder %s1051_s16, %s1047_s15 }
   0xd   : > { %s1496_s22 = smov (%p36_p0, %s34_s22), 0  ;;  %p61_p5 = scmp.eq.s32.totalorder %s1130_s20, 0 }
   0xe   : > { %1471 = sst [smem:[#allocation14_spill]] %s1496_s22  ;;  %p1139_p4 = por %p1032_p1, %p55_p2 }
   0xf   : > { %p1144_p6 = por %p61_p5, %p60_p3  ;;  %s134_s25 = ssub.s32 %s1059_s18, %s1496_s22 }
  0x10   : > { %p135_p7 = scmp.eq.s32.totalorder %s134_s25, 0  ;;  %s137_s26 = sadd.s32 1, %s1043_s14 }
  0x11   : > { %s1473_s24 = scalar_select %p1144_p6, 1, 0 }
  0x12   : > { %s1152_s27 = scalar_select %p135_p7, %s1043_s14, %s137_s26  }
  0x13   : > { %p147_p8 = scmp.ne.s32.totalorder %s1043_s14, %s1039_s13  ;;  %p148_p9 = scmp.eq.s32.totalorder %s1130_s20, 1 }
  0x14   : > { %p153_p10 = scmp.ne.s32.totalorder %s1039_s13, %s1035_s12  ;;  %p154_p11 = scmp.eq.s32.totalorder %s731_s21, 1 }
  0x15   : > { %p1159_p12 = por %p148_p9, %p147_p8  ;;  %p782_p1 = scmp.lt.s32.totalorder %s1063_s19, 2 }
  0x16   : > { %p1164_p0 = por %p154_p11, %p153_p10  ;;  %s198_s4 = sand.u32 1, %s1063_s19  }
  0x17   : > { %s1474_s28 = scalar_select %p1159_p12, 1, 0 }
  0x18   : > { %s1475_s29 = scalar_select %p1164_p0, 1, 0 }
  0x19   : > { %p1171_p2 = pnand %p782_p1, %p1139_p4  ;;  %s1065_s5 = smov [#allocation6]  }
  0x1a   : > { %s212_s6 = sshll.u32 %s1065_s5, 4  ;;  %s1177_s7 = scalar_lea.sflag [#allocation7], %s198_s4  ;;  %s213_s6 = int_to_ptr.vmem [resolvable:$true] %s212_s6 }
  0x1b   : > { %s874_s10 = scalar_lea.hbm %s1459_s1, 1024  ;;  %p1187_p4 = pneg %p1171_p2 }
  0x1c   : > { %p875_p5 = scmp.ne.s32.totalorder %s1459_s1, %s874_s10  ;;  %p881_p9 = scmp.lt.s32.totalorder %s874_s10, %s874_s10 }
  0x1e   : > { %p877_p7 = pnand %p1187_p4, %p875_p5 }
  0x20   : > { %p878_p8 = pneg %p877_p7 }
  0x22   : > { %p883_p10 = pnand %p881_p9, %p878_p8 }
  0x24   : > { %886 = shalt.err (!%p883_p10)
}
  0x25   : > { %s887_s23 = scalar_lea.vmem %s213_s6, 1024  ;;  %s894_s25 = scalar_lea.vmem %s213_s6, 2048 }
  0x26   : > { %p888_p11 = scmp.ne.s32.totalorder %s213_s6, %s887_s23  ;;  %p895_p3 = scmp.lt.s32.totalorder %s213_s6, %s213_s6 }
  0x27   : > { %p896_p0 = scmp.lt.s32.totalorder %s894_s25, %s887_s23 }
  0x28   : > { %p890_p1 = pnand %p888_p11, %p1187_p4 }
  0x29   : > { %p897_p12 = por %p896_p0, %p895_p3 }
  0x2a   : > { %p891_p13 = pneg %p890_p1 }
  0x2c   : > { %p898_p6 = pnand %p897_p12, %p891_p13 }
  0x2e   : > { %901 = shalt.err (!%p898_p6)
}
  0x2f   : > { %s1066_s26 = smov 128   ;;  %s1067_s4 = smov 8  }
  0x30   : > { %774 = dma.hbm_to_vmem [thread:$0]  (!%p1171_p2), %s1459_s1, 1024, %s213_s6, %s1177_s7, %s1066_s26, %s1066_s26, %s1067_s4  }
  0x31   : > { %p244_p5 = scmp.lt.s32.totalorder %s1063_s19, 3  ;;  %p1478_p7 = scmp.ge.s32.totalorder %s1063_s19, 1 }
  0x32   : > { %s1068_s10 = smov [#allocation3]   ;;  %s902_s25 = scalar_lea.hbm %s1458_s0, 1024 }
  0x33   : > { %p1207_p0 = pnand %p1478_p7, %p244_p5  ;;  %s188_s11 = sshll.u32 %s1068_s10, 4  ;;  %s189_s11 = int_to_ptr.vmem [resolvable:$true] %s188_s11 }
  0x34   : > { %p903_p6 = scmp.ne.s32.totalorder %s1458_s0, %s902_s25  ;;  %p909_p3 = scmp.lt.s32.totalorder %s902_s25, %s902_s25 }
  0x35   : > { %s1479_s9 = scalar_select %p1207_p0, 1, 0 }
  0x36   : > { %p905_p12 = pnand %p903_p6, %p1187_p4 }
  0x38   : > { %p906_p13 = pneg %p905_p12 }
  0x3a   : > { %p911_p8 = pnand %p909_p3, %p906_p13 }
  0x3c   : > { %914 = shalt.err (!%p911_p8)
}
  0x3d   : > { %s915_s6 = scalar_lea.vmem %s189_s11, 1024  ;;  %s922_s5 = scalar_lea.vmem %s189_s11, 2048 }
  0x3e   : > { %p916_p9 = scmp.ne.s32.totalorder %s189_s11, %s915_s6  ;;  %p923_p1 = scmp.lt.s32.totalorder %s189_s11, %s189_s11 }
  0x3f   : > { %p924_p5 = scmp.lt.s32.totalorder %s922_s5, %s915_s6 }
  0x40   : > { %p918_p10 = pnand %p916_p9, %p1187_p4 }
  0x41   : > { %p925_p7 = por %p924_p5, %p923_p1 }
  0x42   : > { %p919_p11 = pneg %p918_p10 }
  0x44   : > { %p926_p0 = pnand %p925_p7, %p919_p11 }
  0x46   : > { %929 = shalt.err (!%p926_p0)
}
  0x47   : > { %771 = dma.hbm_to_vmem [thread:$0]  (!%p1171_p2), %s1458_s0, 1024, %s189_s11, [#allocation4], %s1066_s26, %s1066_s26, %s1067_s4  }
  0x48   : > { %s1069_s8 = smov [#allocation8]   ;;  %s930_s25 = scalar_lea.hbm %s1460_s2, 1024 }
  0x49   : > { %s236_s10 = sshll.u32 %s1069_s8, 4  ;;  %p931_p0 = scmp.ne.s32.totalorder %s1460_s2, %s930_s25  ;;  %s237_s10 = int_to_ptr.vmem [resolvable:$true] %s236_s10 }
  0x4a   : > { %p937_p13 = scmp.lt.s32.totalorder %s930_s25, %s930_s25 }
  0x4b   : > { %p933_p6 = pnand %p931_p0, %p1187_p4 }
  0x4d   : > { %p934_p12 = pneg %p933_p6 }
  0x4f   : > { %p939_p3 = pnand %p937_p13, %p934_p12 }
  0x51   : > { %942 = shalt.err (!%p939_p3)
}
  0x52   : > { %s943_s18 = scalar_lea.vmem %s237_s10, 1024  ;;  %s950_s11 = scalar_lea.vmem %s237_s10, 2048 }
  0x53   : > { %p944_p8 = scmp.ne.s32.totalorder %s237_s10, %s943_s18  ;;  %p951_p11 = scmp.lt.s32.totalorder %s237_s10, %s237_s10 }
  0x54   : > { %p952_p1 = scmp.lt.s32.totalorder %s950_s11, %s943_s18 }
  0x55   : > { %p946_p9 = pnand %p944_p8, %p1187_p4 }
  0x56   : > { %p953_p5 = por %p952_p1, %p951_p11 }
  0x57   : > { %p947_p10 = pneg %p946_p9 }
  0x59   : > { %p954_p7 = pnand %p953_p5, %p947_p10 }
  0x5b   : > { %957 = shalt.err (!%p954_p7)
}
  0x5c   : > { %777 = dma.hbm_to_vmem [thread:$0]  (!%p1171_p2), %s1460_s2, 1024, %s237_s10, %s1177_s7, %s1066_s26, %s1066_s26, %s1067_s4  }
  0x5d   : > { %p1480_p0 = scmp.ne.s32.totalorder %s1479_s9, 0 }
  0x5e   : > { %s250_s21 = sand.u32 (!%p1480_p0), 1, %s1051_s16   ;;  %p1481_p4 = scmp.ne.s32.totalorder (!%p1480_p0), %s1473_s24, 0 }
  0x5f   : > { %248 = sbr.rel (%p1480_p0) target bundleno = 510 (0x1fe), region = 32  ;;  %s744_s15 = sshll.u32 (!%p1480_p0), %s250_s21, 6 }
  0x60   : > { %s251_s23 = scalar_lea.sflag (!%p1480_p0), [#allocation4], %s250_s21  ;;  %s1251_s25 = scalar_lea.vmem (!%p1480_p0), [#allocation3], %s744_s15 }
  0x64   : > { %1021 = dma.done.wait (%p1481_p4), %s251_s23, 1024  }
  0x65   : > { %1023 = vsyncadd (%p1481_p4), %s251_s23, 4294966272  ;;  %s259_s30 = sand.u32 1, %s1130_s20   ;;  %s1258_s7 = scalar_lea.vmem [#allocation6], %s744_s15 }
  0x66   : > { %s260_s6 = scalar_lea.sflag [#allocation7], %s259_s30 }
  0x67   : > { %1025 = dma.done.wait (%p1481_p4), %s260_s6, 2048  }
  0x68   : > { %1027 = vsyncadd (%p1481_p4), %s260_s6, 4294965248  ;;  %v353_v0 = vld [vmem:[%s1251_s25 + $0x10] sm:$0xff]  ;;  %s1265_s26 = scalar_lea.vmem [#allocation8], %s744_s15  ;;  %v351_v3 = vld [vmem:[%s1251_s25] sm:$0xff]  ;;  %v325_v40 = vlaneseq  ;;  %s748_s20 = sshll.u32 %s1055_s17, 6 }
  0x69   : > { %v377_v1 = vld [vmem:[%s1265_s26 + $0x10] sm:$0xff]  ;;  %v361_v2 = vadd.f32 1e-06, %v353_v0  ;;  %v375_v4 = vld [vmem:[%s1265_s26] sm:$0xff]  ;;  %v359_v5 = vadd.f32 1e-06, %v351_v3  ;;  %v334_v45 = vstv %s748_s20 }
  0x6a   : > { %v354_v6 = vld [vmem:[%s1251_s25 + $0x18] sm:$0xff]  ;;  %v352_v10 = vld [vmem:[%s1251_s25 + $0x8] sm:$0xff]  ;;  %v355_v17 = vld [vmem:[%s1251_s25 + $0x20] sm:$0xff]  ;;  %v326_v41 = vshrl.u32 %v325_v40, 7  ;;  %s302_s24 = sand.u32 1, %s1039_s13   ;;  %s750_s10 = sshll.u32 %s1055_s17, 7 }
  0x6b   : > { %v378_v7 = vld [vmem:[%s1265_s26 + $0x18] sm:$0xff]  ;;  %v393_v8 = vsub.f32 %v361_v2, %v377_v1  ;;  %v362_v9 = vadd.f32 1e-06, %v354_v6  ;;  %v376_v11 = vld [vmem:[%s1265_s26 + $0x8] sm:$0xff]  ;;  %v391_v12 = vsub.f32 %v359_v5, %v375_v4  ;;  %v360_v13 = vadd.f32 1e-06, %v352_v10  ;;  %s1412_s15 = scalar_lea.hbm %s1461_s3, %s750_s10 }
  0x6c   : > { %v356_v14 = vld [vmem:[%s1251_s25 + $0x28] sm:$0xff]  ;;  %v358_v21 = vld [vmem:[%s1251_s25 + $0x38] sm:$0xff]  ;;  %v379_v24 = vld [vmem:[%s1265_s26 + $0x20] sm:$0xff]  ;;  %v363_v27 = vadd.f32 1e-06, %v355_v17  ;;  %v327_v43 = vadd.s32 8, %v326_v41  ;;  %v1286_v50 = vadd.s32 %v334_v45, %v326_v41 }
  0x6d   : > { %v449_v15 = vmul.f32 %v393_v8, %v393_v8  ;;  %v394_v16 = vsub.f32 %v362_v9, %v378_v7  ;;  %v447_v18 = vmul.f32 %v391_v12, %v391_v12  ;;  %v392_v19 = vsub.f32 %v360_v13, %v376_v11  ;;  %v380_v20 = vld [vmem:[%s1265_s26 + $0x28] sm:$0xff]  ;;  %v357_v25 = vld [vmem:[%s1251_s25 + $0x30] sm:$0xff]  ;;  %v382_v28 = vld [vmem:[%s1265_s26 + $0x38] sm:$0xff]  ;;  %s747_s4 = sshll.u32 %s302_s24, 3  ;;  %s596_s23 = scalar_lea.sflag [#allocation5], %s302_s24 }
  0x6e   : > { %v364_v23 = vadd.f32 1e-06, %v356_v14  ;;  %v366_v30 = vadd.f32 1e-06, %v358_v21  ;;  %v381_v31 = vld [vmem:[%s1265_s26 + $0x30] sm:$0xff]  ;;  %v395_v32 = vsub.f32 %v363_v27, %v379_v24  ;;  %v367_v42 = vld [vmem:[%s1258_s7] sm:$0xff]  ;;  %v1288_v51 = vadd.s32 %v334_v45, %v327_v43 }
  0x6f   : > { %459 = vadd.xlane.f32.xlu1 %v449_v15  ;;  %v450_v22 = vmul.f32 %v394_v16, %v394_v16  ;;  %455 = vadd.xlane.f32.xlu0 %v447_v18  ;;  %v448_v26 = vmul.f32 %v392_v19, %v392_v19  ;;  %v365_v33 = vadd.f32 1e-06, %v357_v25  ;;  %v368_v44 = vld [vmem:[%s1258_s7 + $0x8] sm:$0xff]  ;;  %v383_v46 = vsub.f32 %v359_v5, %v367_v42  ;;  %v369_v49 = vld [vmem:[%s1258_s7 + $0x10] sm:$0xff]  ;;  %v370_v53 = vld [vmem:[%s1258_s7 + $0x18] sm:$0xff]  ;;  %s304_s5 = scalar_lea.vmem [#allocation9], %s747_s4 }
  0x70   : > { %v396_v29 = vsub.f32 %v364_v23, %v380_v20  ;;  %v398_v35 = vsub.f32 %v366_v30, %v382_v28  ;;  %v451_v36 = vmul.f32 %v395_v32, %v395_v32  ;;  %v384_v47 = vsub.f32 %v360_v13, %v368_v44  ;;  %v371_v60 = vld [vmem:[%s1258_s7 + $0x20] sm:$0xff]  ;;  %v372_v0 = vld [vmem:[%s1258_s7 + $0x28] sm:$0xff]  ;;  %v373_v1 = vld [vmem:[%s1258_s7 + $0x30] sm:$0xff]  ;;  %s609_s18 = sshll.u32 %s304_s5, 4  ;;  %p1486_p6 = scmp.ne.s32.totalorder %s1474_s28, 0  ;;  %s610_s18 = int_to_ptr.vmem [resolvable:$true] %s609_s18 }
  0x71   : > { %v397_v37 = vsub.f32 %v365_v33, %v381_v31  ;;  %v328_v48 = vadd.s32 16, %v326_v41  ;;  %v329_v52 = vadd.s32 24, %v326_v41  ;;  %v385_v54 = vsub.f32 %v361_v2, %v369_v49  ;;  %v374_v15 = vld [vmem:[%s1258_s7 + $0x38] sm:$0xff]  ;;  %s958_s25 = scalar_lea.vmem %s610_s18, 128  ;;  %s1070_s30 = smov [#allocation9]  }
  0x72   : > { %v452_v34 = vmul.f32 %v396_v29, %v396_v29  ;;  %v454_v38 = vmul.f32 %v398_v35, %v398_v35  ;;  %v399_v55 = vmul.f32 %v383_v46, %v383_v46  ;;  %v400_v56 = vmul.f32 %v384_v47, %v384_v47  ;;  %p959_p2 = scmp.ne.s32.totalorder %s610_s18, %s958_s25  ;;  %s962_s17 = sshll.u32 %s1070_s30, 4  ;;  %s963_s17 = int_to_ptr.vmem [resolvable:$false] %s962_s17 }
  0x73   : > { %461 = vadd.xlane.f32.xlu1 %v450_v22  ;;  %457 = vadd.xlane.f32.xlu0 %v448_v26  ;;  %v453_v39 = vmul.f32 %v397_v37, %v397_v37  ;;  %v1291_v57 = vadd.s32 %v334_v45, %v328_v48  ;;  %vm343_vm0 = vcmp.lt.s32.totalorder %v1286_v50, 64  ;;  %v386_v58 = vsub.f32 %v362_v9, %v370_v53  ;;  %s964_s6 = scalar_lea.vmem %s963_s17, 256  ;;  %p965_p3 = scmp.lt.s32.totalorder %s610_s18, %s963_s17 }
  0x74   : > { %vm344_vm1 = vcmp.lt.s32.totalorder %v1288_v51, 64  ;;  %v1295_v59 = vadd.s32 %v334_v45, %v329_v52  ;;  %v401_v61 = vmul.f32 %v385_v54, %v385_v54  ;;  %v423_v62 = vsel %vm343_vm0, %v399_v55, 0.0  ;;  %p960_p12 = pnand %p959_p2, %p1486_p6  ;;  %p966_p8 = scmp.lt.s32.totalorder %s964_s6, %s958_s25 }
  0x75   : > { %v424_v63 = vsel %vm344_vm1, %v400_v56, 0.0  ;;  %vm345_vm2 = vcmp.lt.s32.totalorder %v1291_v57, 64  ;;  %v402_v2 = vmul.f32 %v386_v58, %v386_v58  ;;  %v387_v3 = vsub.f32 %v363_v27, %v371_v60 }
  0x76   : > { %vm346_vm3 = vcmp.lt.s32.totalorder %v1295_v59, 64  ;;  %v431_v4 = vadd.f32 %v424_v63, %v423_v62  ;;  %v388_v5 = vsub.f32 %v364_v23, %v372_v0  ;;  %v389_v6 = vsub.f32 %v365_v33, %v373_v1  ;;  %p961_p13 = pneg %p960_p12  ;;  %p967_p9 = por %p966_p8, %p965_p3 }
  0x77   : > { %465 = vadd.xlane.f32.xlu1 %v452_v34  ;;  %463 = vadd.xlane.f32.xlu0 %v451_v36  ;;  %v425_v7 = vsel %vm345_vm2, %v401_v61, 0.0  ;;  %v330_v8 = vadd.s32 32, %v326_v41  ;;  %v426_v9 = vsel %vm346_vm3, %v402_v2, 0.0  ;;  %v403_v10 = vmul.f32 %v387_v3, %v387_v3 }
  0x78   : > { %v331_v11 = vadd.s32 40, %v326_v41  ;;  %v332_v12 = vadd.s32 48, %v326_v41  ;;  %v333_v13 = vadd.s32 56, %v326_v41  ;;  %v404_v16 = vmul.f32 %v388_v5, %v388_v5  ;;  %p968_p10 = pnand %p967_p9, %p961_p13 }
  0x79   : > { %v1310_v14 = vadd.s32 %v334_v45, %v330_v8  ;;  %v390_v17 = vsub.f32 %v366_v30, %v374_v15  ;;  %v405_v18 = vmul.f32 %v389_v6, %v389_v6  ;;  %v432_v19 = vadd.f32 %v431_v4, %v425_v7 }
  0x7a   : > { %v1313_v20 = vadd.s32 %v334_v45, %v331_v11  ;;  %v1315_v21 = vadd.s32 %v334_v45, %v332_v12  ;;  %v1317_v22 = vadd.s32 %v334_v45, %v333_v13 }
  0x7b   : > { %469 = vadd.xlane.f32.xlu1 %v454_v38  ;;  %467 = vadd.xlane.f32.xlu0 %v453_v39  ;;  %vm1469_vm4 = vcmp.lt.s32.totalorder %v1310_v14, 64  ;;  %v433_v24 = vadd.f32 %v432_v19, %v426_v9  ;;  %v406_v25 = vmul.f32 %v390_v17, %v390_v17 }
  0x7c   : > { %v427_v23 = vsel %vm1469_vm4, %v403_v10, 0.0  ;;  %vm1468_vm5 = vcmp.lt.s32.totalorder %v1313_v20, 64  ;;  %vm1467_vm6 = vcmp.lt.s32.totalorder %v1315_v21, 64  ;;  %vm1466_vm7 = vcmp.lt.s32.totalorder %v1317_v22, 64 }
  0x7d   : > { %v428_v26 = vsel %vm1468_vm5, %v404_v16, 0.0  ;;  %v434_v27 = vadd.f32 %v433_v24, %v427_v23  ;;  %v429_v28 = vsel %vm1467_vm6, %v405_v18, 0.0  ;;  %v430_v30 = vsel %vm1466_vm7, %v406_v25, 0.0 }
  0x7e   : > { %vm559_vm5 = vcmask 7168  }
  0x7f   : > { %v435_v29 = vadd.f32 %v434_v27, %v428_v26 }
  0x81   : > { %v436_v31 = vadd.f32 %v435_v29, %v429_v28 }
  0x83   : > { %v437_v32 = vadd.f32 %v436_v31, %v430_v30 }
  0x85   : > { %438 = vadd.xlane.f32.xlu0 %v437_v32 }
  0xf8   : > { %v460_v33 = vpop.xlane.xlu1 %459  ;;  %v456_v34 = vpop.xlane.xlu0 %455 }
  0xf9   : > { %858 = vrsqrt.f32 %v460_v33  ;;  %vm487_vm8 = vcmp.eq.f32.partialorder %v460_v33, inf  ;;  %vm489_vm9 = vcmp.eq.f32.partialorder %v460_v33, 0.0  ;;  %v490_v42 = vand.u32 2147483648, %v460_v33 }
  0xfa   : > { %860 = vrsqrt.f32 %v456_v34  ;;  %vm473_vm10 = vcmp.eq.f32.partialorder %v456_v34, inf  ;;  %vm475_vm11 = vcmp.eq.f32.partialorder %v456_v34, 0.0  ;;  %v476_v45 = vand.u32 2147483648, %v456_v34 }
  0xfc   : > { %v462_v35 = vpop.xlane.xlu1 %461  ;;  %v458_v36 = vpop.xlane.xlu0 %457 }
  0xfd   : > { %862 = vrsqrt.f32 %v462_v35  ;;  %vm494_vm12 = vcmp.eq.f32.partialorder %v462_v35, inf  ;;  %vm496_vm13 = vcmp.eq.f32.partialorder %v462_v35, 0.0  ;;  %v497_v47 = vand.u32 2147483648, %v462_v35 }
  0xfe   : > { %864 = vrsqrt.f32 %v458_v36  ;;  %vm480_vm14 = vcmp.eq.f32.partialorder %v458_v36, inf  ;;  %vm482_vm15 = vcmp.eq.f32.partialorder %v458_v36, 0.0  ;;  %v483_v49 = vand.u32 2147483648, %v458_v36 }
 0x100   : > { %v1331_v37 = vpop.xlane.xlu1 %465  ;;  %v1334_v38 = vpop.xlane.xlu0 %463 }
 0x101   : > { %866 = vrsqrt.f32 %v1331_v37  ;;  %vm508_vm7 = vcmp.eq.f32.partialorder %v1331_v37, inf  ;;  %vm510_vm6 = vcmp.eq.f32.partialorder %v1331_v37, 0.0  ;;  %v511_v61 = vand.u32 2147483648, %v1331_v37 }
 0x102   : > { %868 = vrsqrt.f32 %v1334_v38  ;;  %vm503_vm4 = vcmp.eq.f32.partialorder %v1334_v38, 0.0  ;;  %v504_v2 = vand.u32 2147483648, %v1334_v38 }
 0x104   : > { %v1337_v39 = vpop.xlane.xlu1 %469  ;;  %v1340_v40 = vpop.xlane.xlu0 %467 }
 0x105   : > { %870 = vrsqrt.f32 %v1337_v39  ;;  %v525_v11 = vand.u32 2147483648, %v1337_v39  ;;  %v518_v18 = vand.u32 2147483648, %v1340_v40 }
 0x106   : > { %v859_v41 = vpop.eup %858  ;;  %872 = vrsqrt.f32 %v1340_v40 }
 0x107   : > { %v861_v43 = vpop.eup %860  ;;  %v486_v44 = vmul.f32 %v859_v41, %v460_v33 }
 0x108   : > { %v472_v46 = vmul.f32 %v861_v43, %v456_v34 }
 0x109   : > { %v488_v48 = vsel %vm487_vm8, %v460_v33, %v486_v44  ;;  %vm501_vm8 = vcmp.eq.f32.partialorder %v1334_v38, inf }
 0x10a   : > { %v863_v52 = vpop.eup %862  ;;  %v491_v53 = vsel %vm489_vm9, %v490_v42, %v488_v48  ;;  %v474_v54 = vsel %vm473_vm10, %v456_v34, %v472_v46  ;;  %vm522_vm9 = vcmp.eq.f32.partialorder %v1337_v39, inf  ;;  %vm524_vm10 = vcmp.eq.f32.partialorder %v1337_v39, 0.0 }
 0x10b   : > { %v865_v55 = vpop.eup %864  ;;  %v529_v56 = vsub.f32 2.0, %v491_v53  ;;  %v477_v58 = vsel %vm475_vm11, %v476_v45, %v474_v54  ;;  %v493_v60 = vmul.f32 %v863_v52, %v462_v35  ;;  %vm515_vm11 = vcmp.eq.f32.partialorder %v1340_v40, inf }
 0x10c   : > { %v527_v62 = vsub.f32 2.0, %v477_v58  ;;  %v479_v63 = vmul.f32 %v865_v55, %v458_v36 }
 0x10d   : > { %v537_v0 = vmax.f32 %v529_v56, 0.0  ;;  %v495_v1 = vsel %vm494_vm12, %v462_v35, %v493_v60 }
 0x10e   : > { %v867_v3 = vpop.eup %866  ;;  %v535_v4 = vmax.f32 %v527_v62, 0.0  ;;  %v498_v5 = vsel %vm496_vm13, %v497_v47, %v495_v1  ;;  %v481_v6 = vsel %vm480_vm14, %v458_v36, %v479_v63 }
 0x10f   : > { %v869_v7 = vpop.eup %868  ;;  %v530_v8 = vsub.f32 2.0, %v498_v5  ;;  %v484_v9 = vsel %vm482_vm15, %v483_v49, %v481_v6  ;;  %v507_v10 = vmul.f32 %v867_v3, %v1331_v37  ;;  %v545_v16 = vmul.f32 %v537_v0, %v537_v0  ;;  %v439_v6 = vpop.xlane.xlu0 %438 }
 0x110   : > { %v543_v12 = vmul.f32 %v535_v4, %v535_v4  ;;  %v528_v13 = vsub.f32 2.0, %v484_v9  ;;  %v500_v15 = vmul.f32 %v869_v7, %v1334_v38  ;;  %v440_v7 = vrot.slane %v439_v6, 4 }
 0x111   : > { %v509_v17 = vsel %vm508_vm7, %v1331_v37, %v507_v10  ;;  %v538_v19 = vmax.f32 %v530_v8, 0.0  ;;  %vm517_vm7 = vcmp.eq.f32.partialorder %v1340_v40, 0.0  ;;  %v553_v37 = vsel %vm345_vm2, %v545_v16, 0.0 }
 0x112   : > { %v871_v23 = vpop.eup %870  ;;  %v536_v24 = vmax.f32 %v528_v13, 0.0  ;;  %v502_v25 = vsel %vm501_vm8, %v1334_v38, %v500_v15  ;;  %v512_v26 = vsel %vm510_vm6, %v511_v61, %v509_v17  ;;  %v551_v27 = vsel %vm343_vm0, %v543_v12, 0.0 }
 0x113   : > { %v873_v28 = vpop.eup %872  ;;  %v521_v29 = vmul.f32 %v871_v23, %v1337_v39  ;;  %v505_v30 = vsel %vm503_vm4, %v504_v2, %v502_v25  ;;  %v532_v31 = vsub.f32 2.0, %v512_v26  ;;  %v546_v32 = vmul.f32 %v538_v19, %v538_v19 }
 0x114   : > { %v544_v33 = vmul.f32 %v536_v24, %v536_v24  ;;  %v514_v34 = vmul.f32 %v873_v28, %v1340_v40  ;;  %v531_v35 = vsub.f32 2.0, %v505_v30  ;;  %v560_v41 = vsel %vm559_vm5, %v551_v27, 0.0 }
 0x115   : > { %v523_v36 = vsel %vm522_vm9, %v1337_v39, %v521_v29  ;;  %v540_v50 = vmax.f32 %v532_v31, 0.0  ;;  %v554_v47 = vsel %vm346_vm3, %v546_v32, 0.0  ;;  %vm1482_vm0 = vcmp.lt.s32.totalorder %v1310_v14, 64 }
 0x116   : > { %v516_v38 = vsel %vm515_vm11, %v1340_v40, %v514_v34  ;;  %v526_v42 = vsel %vm524_vm10, %v525_v11, %v523_v36  ;;  %v539_v43 = vmax.f32 %v531_v35, 0.0  ;;  %v552_v44 = vsel %vm344_vm1, %v544_v33, 0.0 }
 0x117   : > { %v519_v45 = vsel %vm517_vm7, %v518_v18, %v516_v38  ;;  %v534_v46 = vsub.f32 2.0, %v526_v42  ;;  %v561_v57 = vsel %vm559_vm5, %v552_v44, 0.0  ;;  %v548_v52 = vmul.f32 %v540_v50, %v540_v50 }
 0x118   : > { %v533_v48 = vsub.f32 2.0, %v519_v45  ;;  %v547_v49 = vmul.f32 %v539_v43, %v539_v43  ;;  %v562_v53 = vadd.f32 %v561_v57, %v560_v41  ;;  %v563_v40 = vsel %vm559_vm5, %v553_v37, 0.0 }
 0x119   : > { %v542_v54 = vmax.f32 %v534_v46, 0.0  ;;  %v565_v56 = vsel %vm559_vm5, %v554_v47, 0.0  ;;  %vm1483_vm1 = vcmp.lt.s32.totalorder %v1313_v20, 64  ;;  %vm1484_vm2 = vcmp.lt.s32.totalorder %v1315_v21, 64 }
 0x11a   : > { %v541_v39 = vmax.f32 %v533_v48, 0.0  ;;  %v555_v55 = vsel %vm1482_vm0, %v547_v49, 0.0  ;;  %v564_v51 = vadd.f32 %v563_v40, %v562_v53  ;;  %v556_v59 = vsel %vm1483_vm1, %v548_v52, 0.0 }
 0x11b   : > { %v550_v60 = vmul.f32 %v542_v54, %v542_v54  ;;  %v567_v62 = vsel %vm559_vm5, %v555_v55, 0.0  ;;  %v569_v1 = vsel %vm559_vm5, %v556_v59, 0.0  ;;  %vm1485_vm3 = vcmp.lt.s32.totalorder %v1317_v22, 64 }
 0x11c   : > { %v549_v58 = vmul.f32 %v541_v39, %v541_v39  ;;  %v566_v61 = vadd.f32 %v565_v56, %v564_v51  ;;  %v441_v8 = vadd.f32 %v440_v7, %v439_v6 }
 0x11d   : > { %v558_v14 = vsel %vm1485_vm3, %v550_v60, 0.0 }
 0x11e   : > { %v557_v63 = vsel %vm1484_vm2, %v549_v58, 0.0  ;;  %v568_v0 = vadd.f32 %v567_v62, %v566_v61  ;;  %v573_v5 = vsel %vm559_vm5, %v558_v14, 0.0  ;;  %v442_v21 = vrot.slane %v441_v8, 2 }
 0x11f   : > { %v571_v3 = vsel %vm559_vm5, %v557_v63, 0.0 }
 0x120   : > { %v570_v2 = vadd.f32 %v569_v1, %v568_v0  ;;  %v443_v9 = vadd.f32 %v442_v21, %v441_v8 }
 0x122   : > { %v572_v4 = vadd.f32 %v571_v3, %v570_v2  ;;  %v444_v10 = vrot.slane %v443_v9, 1 }
 0x124   : > { %v574_v20 = vadd.f32 %v573_v5, %v572_v4  ;;  %v445_v11 = vadd.f32 %v444_v10, %v443_v9 }
 0x126   : > { %575 = vadd.xlane.f32.xlu1 %v574_v20  ;;  %756 = vpush %v445_v11 }
 0x157   : > { %s757_s9 = spop %756 }
 0x1af   : > { %v576_v22 = vpop.xlane.xlu1 %575 }
 0x1b0   : > { %v577_v12 = vrot.slane %v576_v22, 4 }
 0x1b2   : > { %v578_v13 = vadd.f32 %v577_v12, %v576_v22 }
 0x1b4   : > { %v579_v15 = vrot.slane %v578_v13, 2 }
 0x1b6   : > { %v580_v16 = vadd.f32 %v579_v15, %v578_v13 }
 0x1b8   : > { %v581_v17 = vrot.slane %v580_v16, 1 }
 0x1ba   : > { %v582_v18 = vadd.f32 %v581_v17, %v580_v16 }
 0x1bc   : > { %758 = vpush %v582_v18 }
 0x1ed   : > { %s759_s11 = spop %758 }
 0x1ee   : > { %s585_s22 = sadd.f32 %s759_s11, %s757_s9 }
 0x1f0   : > { %v593_v19 = vstv %s585_s22 }
 0x1f1   : > { %594 = vst [vmem:[%s304_s5] sm:$0xff] %v593_v19 }
 0x1f2   : > { %971 = shalt.err (!%p968_p10)
}
 0x1f3   : > { %s972_s7 = scalar_lea.hbm %s1412_s15, 128  ;;  %s976_s24 = scalar_lea.hbm %s1461_s3, 256 }
 0x1f4   : > { %p973_p11 = scmp.ne.s32.totalorder %s1412_s15, %s972_s7  ;;  %p977_p7 = scmp.lt.s32.totalorder %s1412_s15, %s1461_s3 }
 0x1f5   : > { %p978_p0 = scmp.lt.s32.totalorder %s976_s24, %s972_s7 }
 0x1f6   : > { %p974_p1 = pnand %p973_p11, %p1486_p6 }
 0x1f7   : > { %p979_p4 = por %p978_p0, %p977_p7 }
 0x1f8   : > { %p975_p5 = pneg %p974_p1 }
 0x1fa   : > { %p980_p2 = pnand %p979_p4, %p975_p5 }
 0x1fc   : > { %983 = shalt.err (!%p980_p2)
}
 0x1fd   : > { %766 = dma.vmem_to_hbm [thread:$0]  (%p1486_p6), %s610_s18, 128, %s1412_s15, %s596_s23  }
 0x1fe PF: > { %s621_s10 = sand.u32 1, %s1035_s12   ;;  %p1487_p12 = scmp.ne.s32.totalorder %s1475_s29, 0 }
 0x1ff   : > { %p1488_p13 = scmp.ge.s32.totalorder %s1063_s19, 2  ;;  %s622_s5 = scalar_lea.sflag [#allocation5], %s621_s10 }
 0x201   : > { %p779_p3 = pnand %p1488_p13, %p1487_p12 }
 0x203   : > { %p780_p8 = pneg %p779_p3 }
 0x205   : > { %1029 = dma.done.wait (%p780_p8), %s622_s5, 128  }
 0x206   : > { %1031 = vsyncadd (%p780_p8), %s622_s5, 4294967168  ;;  %s22_s19 = sadd.s32 1, %s1063_s19   ;;  %s1489_s17 = sld [smem:[#allocation13_spill]] }
 0x207   : > { %p19_p9 = scmp.ge.s32.totalorder %s22_s19, 4   ;;  %s1490_s18 = sld [smem:[#allocation14_spill]] }
 0x208   : > { %s1491_s12 = smov %s1039_s13  ;;  %s1492_s13 = smov %s1043_s14 }
 0x209   : > { %s1493_s14 = smov %s1152_s27  ;;  %s1494_s15 = smov %s1051_s16 }
 0x20a   : > { %s1448_s16 = smov 0   ;;  %21 = sbr.rel (!%p19_p9) target bundleno = 9 (0x9), region = 111 }
 0x20f   :  { %627 = vsyncpa [#allocation4], 1 }
 0x210   :  { %629 = vsyncpa [#allocation4 + $0x1], 1 }
 0x211   :  { %630 = vsyncpa [#allocation7], 1 }
 0x212   :  { %632 = vsyncpa [#allocation7 + $0x1], 1 }
 0x213   :  { %633 = vsyncpa [#allocation5], 1 }
 0x214   :  { %635 = vsyncpa [#allocation5 + $0x1], 1 }

</bundles_post_ra>
